<compile_context>
chip_gen: v5e
topology: v5e:2x2
jax: 0.10.0
libtpu: 0.0.40
codegen_flags: <defaults>
</compile_context>

<pallas_src>
import functools

import jax
import jax.numpy as jnp
from jax.experimental import pallas as pl
from jax.experimental.pallas import tpu as pltpu

LANES = 128
SUBLANES = 8
MAX_BLOCK_ROWS = 4096  # 4096x128 f32 = 2 MiB/input/step; 2 in x 2 buf = 8 MiB VMEM


def _rmse_partial_kernel(x_ref, y_ref, out_ref, *, blocks_per_slab, block_rows,
                         total_rows, needs_mask):
    """Accumulates sum((x - y)^2) for this slab into out_ref (1, 8, 128)."""
    slab = pl.program_id(0)
    step = pl.program_id(1)

    # Zero this slab's accumulator on its first step.
    @pl.when(step == 0)
    def _():
        out_ref[...] = jnp.zeros_like(out_ref)

    # Hot path: unscaled difference (factor hoisted to the wrapper), square,
    # fold vreg-groups into an (8, 128) accumulator. Pure VPU work.
    x = x_ref[...].astype(jnp.float32)
    y = y_ref[...].astype(jnp.float32)
    d = x - y
    d2 = d * d

    def fold(v):
        return jnp.sum(v.reshape(block_rows // SUBLANES, SUBLANES, LANES),
                       axis=0, keepdims=True)

    if needs_mask:
        block = slab * blocks_per_slab + step
        full_blocks = total_rows // block_rows  # blocks fully inside the array

        # Fast path for fully-valid blocks: no iota / compare / select.
        @pl.when(block < full_blocks)
        def _():
            out_ref[...] += fold(d2)

        # Ragged last block and clamped overflow blocks: mask by global row.
        @pl.when(block >= full_blocks)
        def _():
            row = jax.lax.broadcasted_iota(jnp.int32, (block_rows, LANES), 0)
            valid = (block * block_rows + row) < total_rows
            out_ref[...] += fold(jnp.where(valid, d2, 0.0))
    else:
        out_ref[...] += fold(d2)


def rmse_loss(inputs, targets, value_range=(0.0, 1.0), *,
              max_block_rows=MAX_BLOCK_ROWS, max_slabs=2):
    """Pallas TPU RMSE loss. Returns a float32 scalar."""
    assert inputs.shape == targets.shape
    range_min, range_max = value_range
    factor = 1.0 / (range_max - range_min)
    n = int(inputs.size)
    scale = (float(factor) * float(factor)) / float(n)  # single folded constant

    x = jnp.ravel(inputs)
    y = jnp.ravel(targets)

    rows = n // LANES
    tail = n - rows * LANES

    # <128-element tail handled with plain jnp (no padding of the full arrays).
    tail_sum = None
    if tail:
        xt = x[rows * LANES:].astype(jnp.float32)
        yt = y[rows * LANES:].astype(jnp.float32)
        dt = xt - yt
        tail_sum = jnp.sum(dt * dt)

    if rows == 0:
        return jnp.sqrt(tail_sum * scale).astype(jnp.float32)

    if tail:
        # TODO(synk): zero-copy ragged path via manual DMA; this slice copies
        # the 128-aligned prefix once.
        x = x[: rows * LANES]
        y = y[: rows * LANES]
    x2d = x.reshape(rows, LANES)
    y2d = y.reshape(rows, LANES)

    # Round block rows to the packed-sublane multiple of the source dtype
    # (8 for 32-bit, 16 for bf16, 32 for 8-bit types).
    itemsize = jnp.dtype(inputs.dtype).itemsize
    sub_mult = SUBLANES * max(1, 4 // max(1, itemsize))
    block_rows = min(int(max_block_rows),
                     ((rows + sub_mult - 1) // sub_mult) * sub_mult)
    block_rows = max(sub_mult, (block_rows // sub_mult) * sub_mult)

    n_blocks = (rows + block_rows - 1) // block_rows
    n_slabs = max_slabs if n_blocks >= max_slabs else 1
    blocks_per_slab = (n_blocks + n_slabs - 1) // n_slabs
    # Mask code is emitted only if some scheduled block is ragged / overflow.
    needs_mask = (rows % block_rows != 0) or (n_slabs * blocks_per_slab != n_blocks)

    kernel = functools.partial(
        _rmse_partial_kernel,
        blocks_per_slab=int(blocks_per_slab),
        block_rows=int(block_rows),
        total_rows=int(rows),
        needs_mask=bool(needs_mask),
    )

    def in_map(s, i):
        # Clamp overflow block indices of the last slab onto the last real
        # block; their contribution is fully masked out in-kernel.
        return (jnp.minimum(s * blocks_per_slab + i, n_blocks - 1), 0)

    partials = pl.pallas_call(
        kernel,
        out_shape=jax.ShapeDtypeStruct((n_slabs, SUBLANES, LANES), jnp.float32),
        grid_spec=pltpu.PrefetchScalarGridSpec(
            num_scalar_prefetch=0,
            grid=(n_slabs, blocks_per_slab),
            in_specs=[
                pl.BlockSpec((block_rows, LANES), in_map),
                pl.BlockSpec((block_rows, LANES), in_map),
            ],
            out_specs=pl.BlockSpec((1, SUBLANES, LANES), lambda s, i: (s, 0, 0)),
        ),
        compiler_params=pltpu.CompilerParams(
            # Slab axis shards across TensorCores (v7x); inner axis is the
            # sequential reduction.
            dimension_semantics=("parallel", "arbitrary"),
        ),
    )(x2d, y2d)

    total = jnp.sum(partials)
    if tail_sum is not None:
        total = total + tail_sum
    return jnp.sqrt(total * scale).astype(jnp.float32)


if __name__ == "__main__":
    key = jax.random.PRNGKey(0)
    k1, k2, k3, k4, k5, k6 = jax.random.split(key, 6)

    def ref_rmse(a, b, value_range):
        f = 1.0 / (value_range[1] - value_range[0])
        af = a.astype(jnp.float32)
        bf = b.astype(jnp.float32)
        return jnp.sqrt(jnp.mean((af * f - bf * f) ** 2))

    # 1) NCHW regression shape, 128-aligned -> zero-copy, mask-free fast path.
    x = jax.random.uniform(k1, (2, 4, 16, 16), dtype=jnp.float32)
    t = jax.random.uniform(k2, (2, 4, 16, 16), dtype=jnp.float32)
    loss = jax.block_until_ready(rmse_loss(x, t, value_range=(0.0, 1.0)))
    ref = ref_rmse(x, t, (0.0, 1.0))
    assert jnp.allclose(loss, ref, rtol=1e-5, atol=1e-6), (loss, ref)

    # 2) Ragged size + non-unit range -> jnp tail path + hoisted factor.
    x2 = jax.random.uniform(k3, (2, 3, 10, 10), dtype=jnp.float32) * 2.0
    t2 = jax.random.uniform(k4, (2, 3, 10, 10), dtype=jnp.float32) * 2.0
    loss2 = jax.block_until_ready(rmse_loss(x2, t2, value_range=(0.0, 2.0)))
    ref2 = ref_rmse(x2, t2, (0.0, 2.0))
    assert jnp.allclose(loss2, ref2, rtol=1e-5, atol=1e-6), (loss2, ref2)

    # 3) Multi-block / two-slab path with a ragged last block and a clamped
    #    overflow block (small max_block_rows so it triggers at small size).
    x3 = jax.random.uniform(k5, (2, 4, 24, 24), dtype=jnp.float32)
    t3 = jax.random.uniform(k6, (2, 4, 24, 24), dtype=jnp.float32)
    loss3 = jax.block_until_ready(
        rmse_loss(x3, t3, value_range=(0.0, 1.0), max_block_rows=16))
    ref3 = ref_rmse(x3, t3, (0.0, 1.0))
    assert jnp.allclose(loss3, ref3, rtol=1e-5, atol=1e-6), (loss3, ref3)

    print("KERNEL_OK")
</pallas_src>

<mosaic_0001>
module attributes {stable_mosaic.version = 11 : i64} {
  func.func @_rmse_partial_kernel(%arg0: i32, %arg1: i32, %arg2: memref<16x128xf32, #tpu.memory_space<vmem>>, %arg3: memref<16x128xf32, #tpu.memory_space<vmem>>, %arg4: memref<1x8x128xf32, #tpu.memory_space<vmem>>) attributes {dimension_semantics = [#tpu.dimension_semantics<parallel>, #tpu.dimension_semantics<arbitrary>], iteration_bounds = array<i64: 1, 1>, scalar_prefetch = 0 : i64, scratch_operands = 0 : i64, tpu.core_type = #tpu.core_type<tc>, window_params = [{transform_indices = @transform_0, window_bounds = array<i64: 16, 128>}, {transform_indices = @transform_1, window_bounds = array<i64: 16, 128>}, {transform_indices = @transform_2, window_bounds = array<i64: 1, 8, 128>}]} {
    %c0_i32 = arith.constant 0 : i32
    %0 = arith.cmpi eq, %arg1, %c0_i32 : i32
    %1 = arith.extui %0 : i1 to i32
    %c0_i32_0 = arith.constant 0 : i32
    %2 = arith.cmpi ne, %1, %c0_i32_0 : i32
    scf.if %2 {
      %cst_10 = arith.constant 0.000000e+00 : f32
      %13 = vector.broadcast %cst_10 : f32 to vector<1x8x128xf32>
      %c0_11 = arith.constant 0 : index
      %c0_12 = arith.constant 0 : index
      %c0_13 = arith.constant 0 : index
      %14 = vector.load %arg4[%c0_11, %c0_12, %c0_13] : memref<1x8x128xf32, #tpu.memory_space<vmem>>, vector<1x8x128xf32>
      tpu.vector_store %arg4[%c0_11, %c0_12, %c0_13], %13 {strides = array<i32>} : memref<1x8x128xf32, #tpu.memory_space<vmem>>, vector<1x8x128xf32>,
    } else {
    }
    %c0 = arith.constant 0 : index
    %c0_1 = arith.constant 0 : index
    %3 = vector.load %arg2[%c0, %c0_1] : memref<16x128xf32, #tpu.memory_space<vmem>>, vector<16x128xf32>
    %c0_2 = arith.constant 0 : index
    %c0_3 = arith.constant 0 : index
    %4 = vector.load %arg3[%c0_2, %c0_3] : memref<16x128xf32, #tpu.memory_space<vmem>>, vector<16x128xf32>
    %5 = arith.subf %3, %4 : vector<16x128xf32>
    %6 = arith.mulf %5, %5 : vector<16x128xf32>
    %c0_4 = arith.constant 0 : index
    %c0_5 = arith.constant 0 : index
    %c0_6 = arith.constant 0 : index
    %7 = vector.load %arg4[%c0_4, %c0_5, %c0_6] : memref<1x8x128xf32, #tpu.memory_space<vmem>>, vector<1x8x128xf32>
    %8 = vector.shape_cast %6 : vector<16x128xf32> to vector<2x8x128xf32>
    %cst = arith.constant dense<0.000000e+00> : vector<8x128xf32>
    %9 = vector.multi_reduction <add>, %8, %cst [0] : vector<2x8x128xf32> to vector<8x128xf32>
    %10 = vector.shape_cast %9 : vector<8x128xf32> to vector<1x8x128xf32>
    %11 = arith.addf %7, %10 : vector<1x8x128xf32>
    %c0_7 = arith.constant 0 : index
    %c0_8 = arith.constant 0 : index
    %c0_9 = arith.constant 0 : index
    %12 = vector.load %arg4[%c0_7, %c0_8, %c0_9] : memref<1x8x128xf32, #tpu.memory_space<vmem>>, vector<1x8x128xf32>
    tpu.vector_store %arg4[%c0_7, %c0_8, %c0_9], %11 {strides = array<i32>} : memref<1x8x128xf32, #tpu.memory_space<vmem>>, vector<1x8x128xf32>,
    return
  }
  func.func @transform_0(%arg0: i32, %arg1: i32) -> (i32, i32) {
    %c1_i32 = arith.constant 1 : i32
    %0 = arith.muli %arg0, %c1_i32 : i32
    %1 = arith.addi %0, %arg1 : i32
    %c0_i32 = arith.constant 0 : i32
    %2 = arith.minsi %1, %c0_i32 : i32
    %c0_i32_0 = arith.constant 0 : i32
    %c0_i32_1 = arith.constant 0 : i32
    return %2, %c0_i32_0 : i32, i32
  }
  func.func @transform_1(%arg0: i32, %arg1: i32) -> (i32, i32) {
    %c1_i32 = arith.constant 1 : i32
    %0 = arith.muli %arg0, %c1_i32 : i32
    %1 = arith.addi %0, %arg1 : i32
    %c0_i32 = arith.constant 0 : i32
    %2 = arith.minsi %1, %c0_i32 : i32
    %c0_i32_0 = arith.constant 0 : i32
    %c0_i32_1 = arith.constant 0 : i32
    return %2, %c0_i32_0 : i32, i32
  }
  func.func @transform_2(%arg0: i32, %arg1: i32) -> (i32, i32, i32) {
    %c0_i32 = arith.constant 0 : i32
    %c0_i32_0 = arith.constant 0 : i32
    %c0_i32_1 = arith.constant 0 : i32
    return %arg0, %c0_i32, %c0_i32_0 : i32, i32, i32
  }
}

</mosaic_0001>

<bundles_post_ra>
// kernel: tpu_custom_call.1
= control target key start
LH: loop header
LB: loop body
LE: loop exit
PB: predicated region body
PF: predicated region fallthrough
CT: control target
= control target key end

     0   :  { %7 = vsyncpa [#allocation3], 0  ;;  %s216_s0 = inlined_call_operand.hbm [shape: f32[16,128], index: 0, kind: input, shape index: {}]   ;;  %s217_s1 = inlined_call_operand.hbm [shape: f32[16,128], index: 1, kind: input, shape index: {}]   ;;  %s218_s2 = inlined_call_operand.hbm [shape: f32[1,8,128], index: 2, kind: output, shape index: {}]  }
   0x1   :  { %8 = vsyncpa [#allocation6], 0 }
   0x2   :  { %9 = vsyncpa [#allocation4], 0  ;;  %s20_s11 = sshll.u32 %s216_s0, 4  ;;  %s187_s12 = smov [#allocation2]   ;;  %s21_s11 = int_to_ptr.hbm [resolvable:$true] %s20_s11 }
   0x3   :  { %s22_s13 = sshll.u32 %s187_s12, 4  ;;  %s39_s16 = sshll.u32 %s217_s1, 4  ;;  %s23_s13 = int_to_ptr.vmem [resolvable:$true] %s22_s13  ;;  %s40_s16 = int_to_ptr.hbm [resolvable:$true] %s39_s16 }
   0x4   :  { %s188_s17 = smov 128   ;;  %s189_s18 = smov 8  }
   0x5   :  { %28 = dma.hbm_to_vmem [thread:$0]  %s21_s11, 256, %s23_s13, [#allocation3], %s188_s17, %s188_s17, %s189_s18  }
   0x6   :  { %s190_s19 = smov [#allocation5]  }
   0x7   :  { %s41_s20 = sshll.u32 %s190_s19, 4  ;;  %s42_s20 = int_to_ptr.vmem [resolvable:$true] %s41_s20 }
   0x8   :  { %47 = dma.hbm_to_vmem [thread:$0]  %s40_s16, 256, %s42_s20, [#allocation6], %s188_s17, %s188_s17, %s189_s18  }
   0x9   :  { %181 = dma.done.wait [#allocation3], 256  }
   0xa   :  { %182 = vsyncadd [#allocation3], 4294967040 }
   0xb   :  { %183 = dma.done.wait [#allocation6], 256  }
   0xc   :  { %184 = vsyncadd [#allocation6], 4294967040  ;;  %v69_v0 = vld [vmem:[#allocation2] sm:$0xff]  ;;  %v70_v1 = vld [vmem:[#allocation2 + $0x8] sm:$0xff]  ;;  %s191_s0 = smov [#allocation7]   ;;  %s88_s23 = sshll.u32 %s218_s2, 4  ;;  %s89_s23 = int_to_ptr.hbm [resolvable:$true] %s88_s23 }
   0xd   :  { %v71_v2 = vld [vmem:[#allocation5] sm:$0xff]  ;;  %v72_v3 = vld [vmem:[#allocation5 + $0x8] sm:$0xff]  ;;  %s86_s1 = sshll.u32 %s191_s0, 4  ;;  %s87_s1 = int_to_ptr.vmem [resolvable:$true] %s86_s1 }
   0xe   :  { %v73_v4 = vsub.f32 %v69_v0, %v71_v2  ;;  %v74_v5 = vsub.f32 %v70_v1, %v72_v3 }
  0x10   :  { %v75_v6 = vmul.f32 %v73_v4, %v73_v4  ;;  %v76_v7 = vmul.f32 %v74_v5, %v74_v5 }
  0x12   :  { %v78_v8 = vadd.f32 %v76_v7, %v75_v6 }
  0x14   :  { %80 = vst [vmem:[#allocation7] sm:$0xff] %v78_v8 }
  0x15   :  { %91 = dma.vmem_to_hbm [thread:$0]  %s87_s1, 128, %s89_s23, [#allocation4]  }
  0x16   :  { %185 = dma.done.wait [#allocation4], 128  }
  0x17   :  { %186 = vsyncadd [#allocation4], 4294967168 }
  0x18   :  { %96 = vsyncpa [#allocation3], 1 }
  0x19   :  { %97 = vsyncpa [#allocation6], 1 }
  0x1a   :  { %98 = vsyncpa [#allocation4], 1 }

</bundles_post_ra>
